<compile_context>
chip_gen: v5e
topology: v5e:2x2
jax: 0.10.0
libtpu: 0.0.40
codegen_flags: <defaults>
</compile_context>

<pallas_src>
import functools

import jax
import jax.numpy as jnp
from jax.experimental import pallas as pl
from jax.experimental.pallas import tpu as pltpu


_LANES = 128      # lane width (last-dim padding unit for the hidden dim)
_SUBLANES = 8     # fp32 sublane multiple for the batch tile


def _round_up(n, m):
    return ((n + m - 1) // m) * m


def _vmem_capacity_bytes():
    """Per-core VMEM capacity; conservative v7x-sized fallback if undetectable."""
    try:
        info = pltpu.get_tpu_info()
        cap = getattr(info, "vmem_capacity_bytes", None)
        if cap:
            return int(cap)
    except Exception:
        pass
    return 64 * 1024 * 1024


def _vmem_limit_bytes(tb_eff, in_size, hp, out_size, param_bytes, weight_bufs):
    """Derive the VMEM limit from actual buffer sizes (lane-padded) + headroom."""
    x_tile = tb_eff * _round_up(in_size, _LANES) * 4       # streamed, double-buffered
    out_tile = tb_eff * _round_up(out_size, _LANES) * 4    # streamed, double-buffered
    interm = 2 * tb_eff * hp * 4                            # two live f32 (tb, hp) temps
    need = 2 * (x_tile + out_tile) + weight_bufs * param_bytes + interm + (4 << 20)
    cap = (_vmem_capacity_bytes() * 3) // 4                  # leave 25% compiler headroom
    return int(max(16 << 20, min(need, cap)))


def _pick_tile(batch, tb, min_steps=4):
    """Batch tile: multiple of 8 sublanes, capped at tb, and small enough to give
    >= min_steps grid steps (megacore sharding + pipelining need multiple steps)."""
    tb = max(_SUBLANES, _round_up(int(tb), _SUBLANES))
    tile = min(tb, _round_up(batch, _SUBLANES))
    if batch >= min_steps * _SUBLANES:
        tile = min(tile, _round_up(pl.cdiv(batch, min_steps), _SUBLANES))
    return max(_SUBLANES, _round_up(tile, _SUBLANES))


def _mlp_kernel(x_ref, w0_ref, b0_ref, w1_ref, b1_ref, w2_ref, b2_ref, o_ref):
    """Fused Linear->ReLU->Linear->ReLU->Linear with f32 accumulation."""
    cd = w0_ref.dtype  # f32 for small hidden sizes; bf16 only when MXU-bound

    h = jnp.dot(x_ref[...].astype(cd), w0_ref[...], preferred_element_type=jnp.float32)
    h = jnp.maximum(h + b0_ref[...], 0.0)            # (1, Hp) bias broadcasts over rows

    h = jnp.dot(h.astype(cd), w1_ref[...], preferred_element_type=jnp.float32)
    h = jnp.maximum(h + b1_ref[...], 0.0)

    y = jnp.dot(h.astype(cd), w2_ref[...], preferred_element_type=jnp.float32)
    o_ref[...] = (y + b2_ref[...]).astype(o_ref.dtype)   # narrow (tb, out) store


def prepare_params(w0, b0, w1, b1, w2, b2, *, compute_dtype=None):
    """One-time parameter prep (hoisted out of the per-call hot path).
    Pads the hidden dim to a 128-lane multiple with zeros (ReLU(0)=0 => exact) and
    casts weights to bf16 only when hidden is large enough to be MXU-bound."""
    in_size, hidden = w0.shape
    out_size = w2.shape[1]
    hp = _round_up(hidden, _LANES)
    if compute_dtype is None:
        compute_dtype = jnp.bfloat16 if hidden >= 512 else jnp.float32

    w0p = jnp.zeros((in_size, hp), compute_dtype).at[:, :hidden].set(w0.astype(compute_dtype))
    b0p = jnp.zeros((1, hp), jnp.float32).at[:, :hidden].set(b0.reshape(1, hidden))
    w1p = jnp.zeros((hp, hp), compute_dtype).at[:hidden, :hidden].set(w1.astype(compute_dtype))
    b1p = jnp.zeros((1, hp), jnp.float32).at[:, :hidden].set(b1.reshape(1, hidden))
    w2p = jnp.zeros((hp, out_size), compute_dtype).at[:hidden, :].set(w2.astype(compute_dtype))
    b2p = b2.reshape(1, out_size).astype(jnp.float32)
    return w0p, b0p, w1p, b1p, w2p, b2p


@functools.partial(jax.jit, static_argnames=("tb_eff", "single_buffer_weights"))
def _mlp_pallas(x, w0, b0, w1, b1, w2, b2, *, tb_eff, single_buffer_weights):
    padded, in_size = x.shape
    hp = w0.shape[1]
    out_size = w2.shape[1]
    grid = (padded // tb_eff,)

    if single_buffer_weights:
        # Grid-invariant params: one VMEM buffer is enough (block index never changes,
        # so double-buffering them is pure VMEM waste).
        resident = lambda a: pl.BlockSpec(a.shape, lambda i: (0, 0),
                                          pipeline_mode=pl.Buffered(1))
    else:
        resident = lambda a: pl.BlockSpec(a.shape, lambda i: (0, 0))

    w_itemsize = w0.dtype.itemsize
    param_bytes = ((w0.size + w1.size + w2.size) * w_itemsize
                   + (b0.size + b1.size + b2.size) * 4)
    vmem_limit = _vmem_limit_bytes(tb_eff, in_size, hp, out_size, param_bytes,
                                   1 if single_buffer_weights else 2)

    flops = 2 * padded * (in_size * hp + hp * hp + hp * out_size)
    bytes_accessed = padded * (in_size + out_size) * 4 + param_bytes

    return pl.pallas_call(
        _mlp_kernel,
        out_shape=jax.ShapeDtypeStruct((padded, out_size), jnp.float32),
        grid=grid,
        in_specs=[
            pl.BlockSpec((tb_eff, in_size), lambda i: (i, 0)),   # streamed per row-tile
            resident(w0), resident(b0),                          # VMEM-resident params
            resident(w1), resident(b1),
            resident(w2), resident(b2),
        ],
        # Narrow (tb, out_size) store: 64x less HBM writeback than a padded 128-lane
        # f32 slab; the kernel is writeback-bound at these shapes.
        out_specs=pl.BlockSpec((tb_eff, out_size), lambda i: (i, 0)),
        compiler_params=pltpu.CompilerParams(
            dimension_semantics=("parallel",),       # megacore-shard the batch axis
            vmem_limit_bytes=vmem_limit,
        ),
        cost_estimate=pl.CostEstimate(
            flops=flops, transcendentals=0, bytes_accessed=bytes_accessed),
    )(x, w0, b0, w1, b1, w2, b2)


def mlp_forward(x, params, *, tb=2048):
    """Fused 3-layer MLP forward.
    x: (batch, in_size) f32; params: output of prepare_params.
    tb ~2048 on v5e/v6e, ~4096 on v7x (faster HBM drains tiles quicker, so each
    step needs more bytes to hide the fixed per-step cost)."""
    batch = x.shape[0]
    tb_eff = _pick_tile(batch, tb)
    padded = _round_up(batch, tb_eff)
    if padded != batch:
        x = jnp.pad(x, ((0, padded - batch), (0, 0)))
    try:
        out = jax.block_until_ready(
            _mlp_pallas(x, *params, tb_eff=tb_eff, single_buffer_weights=True))
    except Exception:
        # Fallback for Pallas builds that reject pipeline_mode=pl.Buffered(1).
        out = _mlp_pallas(x, *params, tb_eff=tb_eff, single_buffer_weights=False)
    return out[:batch]


def init_params(key, input_size, hidden_size, output_size):
    """Params matching the module's __init__ (nlayers=3, relu, default init branch):
    first layer PyTorch-default uniform(+-1/sqrt(fan_in)) for weight AND bias;
    hidden/output layers normal(std=0.01) with zero bias."""
    k0w, k0b, k1, k2 = jax.random.split(key, 4)
    bound0 = 1.0 / jnp.sqrt(jnp.float32(input_size))
    w0 = jax.random.uniform(k0w, (input_size, hidden_size), jnp.float32, -bound0, bound0)
    b0 = jax.random.uniform(k0b, (1, hidden_size), jnp.float32, -bound0, bound0)
    w1 = 0.01 * jax.random.normal(k1, (hidden_size, hidden_size), jnp.float32)
    b1 = jnp.zeros((1, hidden_size), jnp.float32)
    w2 = 0.01 * jax.random.normal(k2, (hidden_size, output_size), jnp.float32)
    b2 = jnp.zeros((1, output_size), jnp.float32)
    return w0, b0, w1, b1, w2, b2


def mlp_reference(x, w0, b0, w1, b1, w2, b2):
    h = jnp.maximum(x @ w0 + b0, 0.0)
    h = jnp.maximum(h @ w1 + b1, 0.0)
    return h @ w2 + b2


if __name__ == "__main__":
    # Shapes consistent with the module: MLP(input_size=4, output_size=2, nlayers=3,
    # hidden_size=32, activation='relu'). batch=64 -> tile=16, grid=(4,): exercises
    # the pipelined batch grid with VMEM-resident weights.
    batch, input_size, hidden_size, output_size = 64, 4, 32, 2

    key = jax.random.PRNGKey(0)
    kx, kp = jax.random.split(key)
    x = jax.random.normal(kx, (batch, input_size), jnp.float32)
    raw_params = init_params(kp, input_size, hidden_size, output_size)
    params = prepare_params(*raw_params)   # one-time pad/cast, hoisted off hot path

    out = mlp_forward(x, params)
    out = jax.block_until_ready(out)

    ref = mlp_reference(x, *raw_params)
    assert out.shape == (batch, output_size)
    # f32 compute at this hidden size -> tight tolerance vs the f32 reference.
    assert jnp.allclose(out, ref, atol=1e-4, rtol=1e-3), "mismatch vs reference"

    print("KERNEL_OK")
</pallas_src>

<mosaic_0001>
module attributes {stable_mosaic.version = 11 : i64} {
  func.func @_mlp_kernel(%arg0: i32, %arg1: memref<16x4xf32, #tpu.memory_space<vmem>>, %arg2: memref<4x128xf32, #tpu.memory_space<vmem>>, %arg3: memref<1x128xf32, #tpu.memory_space<vmem>>, %arg4: memref<128x128xf32, #tpu.memory_space<vmem>>, %arg5: memref<1x128xf32, #tpu.memory_space<vmem>>, %arg6: memref<128x2xf32, #tpu.memory_space<vmem>>, %arg7: memref<1x2xf32, #tpu.memory_space<vmem>>, %arg8: memref<16x2xf32, #tpu.memory_space<vmem>>) attributes {dimension_semantics = [#tpu.dimension_semantics<parallel>], iteration_bounds = array<i64: 4>, scalar_prefetch = 0 : i64, scratch_operands = 0 : i64, tpu.core_type = #tpu.core_type<tc>, window_params = [{transform_indices = @transform_0, window_bounds = array<i64: 16, 4>}, {pipeline_mode = #tpu.pipeline_mode<synchronous>, transform_indices = @transform_1, window_bounds = array<i64: 4, 128>}, {pipeline_mode = #tpu.pipeline_mode<synchronous>, transform_indices = @transform_2, window_bounds = array<i64: 1, 128>}, {pipeline_mode = #tpu.pipeline_mode<synchronous>, transform_indices = @transform_3, window_bounds = array<i64: 128, 128>}, {pipeline_mode = #tpu.pipeline_mode<synchronous>, transform_indices = @transform_4, window_bounds = array<i64: 1, 128>}, {pipeline_mode = #tpu.pipeline_mode<synchronous>, transform_indices = @transform_5, window_bounds = array<i64: 128, 2>}, {pipeline_mode = #tpu.pipeline_mode<synchronous>, transform_indices = @transform_6, window_bounds = array<i64: 1, 2>}, {transform_indices = @transform_7, window_bounds = array<i64: 16, 2>}]} {
    %c0 = arith.constant 0 : index
    %c0_0 = arith.constant 0 : index
    %0 = vector.load %arg1[%c0, %c0_0] : memref<16x4xf32, #tpu.memory_space<vmem>>, vector<16x4xf32>
    %c0_1 = arith.constant 0 : index
    %c0_2 = arith.constant 0 : index
    %1 = vector.load %arg2[%c0_1, %c0_2] : memref<4x128xf32, #tpu.memory_space<vmem>>, vector<4x128xf32>
    %cst = arith.constant dense<0.000000e+00> : vector<16x128xf32>
    %2 = tpu.matmul %0, %1, %cst {dimension_numbers = #tpu.dot_dimension_numbers<[1], [0], [0], [1], [0, 0, 1, 1], [], []>} : vector<16x4xf32>, vector<4x128xf32>, vector<16x128xf32> -> vector<16x128xf32>
    %c0_3 = arith.constant 0 : index
    %c0_4 = arith.constant 0 : index
    %3 = vector.load %arg3[%c0_3, %c0_4] : memref<1x128xf32, #tpu.memory_space<vmem>>, vector<1x128xf32>
    %4 = vector.broadcast %3 : vector<1x128xf32> to vector<16x128xf32>
    %5 = arith.addf %2, %4 : vector<16x128xf32>
    %cst_5 = arith.constant 0.000000e+00 : f32
    %6 = vector.broadcast %cst_5 : f32 to vector<16x128xf32>
    %7 = arith.maximumf %5, %6 : vector<16x128xf32>
    %c0_6 = arith.constant 0 : index
    %c0_7 = arith.constant 0 : index
    %8 = vector.load %arg4[%c0_6, %c0_7] : memref<128x128xf32, #tpu.memory_space<vmem>>, vector<128x128xf32>
    %cst_8 = arith.constant dense<0.000000e+00> : vector<16x128xf32>
    %9 = tpu.matmul %7, %8, %cst_8 {dimension_numbers = #tpu.dot_dimension_numbers<[1], [0], [0], [1], [0, 0, 1, 1], [], []>} : vector<16x128xf32>, vector<128x128xf32>, vector<16x128xf32> -> vector<16x128xf32>
    %c0_9 = arith.constant 0 : index
    %c0_10 = arith.constant 0 : index
    %10 = vector.load %arg5[%c0_9, %c0_10] : memref<1x128xf32, #tpu.memory_space<vmem>>, vector<1x128xf32>
    %11 = vector.broadcast %10 : vector<1x128xf32> to vector<16x128xf32>
    %12 = arith.addf %9, %11 : vector<16x128xf32>
    %cst_11 = arith.constant 0.000000e+00 : f32
    %13 = vector.broadcast %cst_11 : f32 to vector<16x128xf32>
    %14 = arith.maximumf %12, %13 : vector<16x128xf32>
    %c0_12 = arith.constant 0 : index
    %c0_13 = arith.constant 0 : index
    %15 = vector.load %arg6[%c0_12, %c0_13] : memref<128x2xf32, #tpu.memory_space<vmem>>, vector<128x2xf32>
    %cst_14 = arith.constant dense<0.000000e+00> : vector<16x2xf32>
    %16 = tpu.matmul %14, %15, %cst_14 {dimension_numbers = #tpu.dot_dimension_numbers<[1], [0], [0], [1], [0, 0, 1, 1], [], []>} : vector<16x128xf32>, vector<128x2xf32>, vector<16x2xf32> -> vector<16x2xf32>
    %c0_15 = arith.constant 0 : index
    %c0_16 = arith.constant 0 : index
    %17 = vector.load %arg7[%c0_15, %c0_16] : memref<1x2xf32, #tpu.memory_space<vmem>>, vector<1x2xf32>
    %18 = vector.broadcast %17 : vector<1x2xf32> to vector<16x2xf32>
    %19 = arith.addf %16, %18 : vector<16x2xf32>
    %c0_17 = arith.constant 0 : index
    %c0_18 = arith.constant 0 : index
    %20 = vector.load %arg8[%c0_17, %c0_18] : memref<16x2xf32, #tpu.memory_space<vmem>>, vector<16x2xf32>
    tpu.vector_store %arg8[%c0_17, %c0_18], %19 {strides = array<i32>} : memref<16x2xf32, #tpu.memory_space<vmem>>, vector<16x2xf32>,
    return
  }
  func.func @transform_0(%arg0: i32) -> (i32, i32) {
    %c0_i32 = arith.constant 0 : i32
    %c0_i32_0 = arith.constant 0 : i32
    return %arg0, %c0_i32 : i32, i32
  }
  func.func @transform_1(%arg0: i32) -> (i32, i32) {
    %c0_i32 = arith.constant 0 : i32
    %c0_i32_0 = arith.constant 0 : i32
    %c0_i32_1 = arith.constant 0 : i32
    return %c0_i32, %c0_i32_0 : i32, i32
  }
  func.func @transform_2(%arg0: i32) -> (i32, i32) {
    %c0_i32 = arith.constant 0 : i32
    %c0_i32_0 = arith.constant 0 : i32
    %c0_i32_1 = arith.constant 0 : i32
    return %c0_i32, %c0_i32_0 : i32, i32
  }
  func.func @transform_3(%arg0: i32) -> (i32, i32) {
    %c0_i32 = arith.constant 0 : i32
    %c0_i32_0 = arith.constant 0 : i32
    %c0_i32_1 = arith.constant 0 : i32
    return %c0_i32, %c0_i32_0 : i32, i32
  }
  func.func @transform_4(%arg0: i32) -> (i32, i32) {
    %c0_i32 = arith.constant 0 : i32
    %c0_i32_0 = arith.constant 0 : i32
    %c0_i32_1 = arith.constant 0 : i32
    return %c0_i32, %c0_i32_0 : i32, i32
  }
  func.func @transform_5(%arg0: i32) -> (i32, i32) {
    %c0_i32 = arith.constant 0 : i32
    %c0_i32_0 = arith.constant 0 : i32
    %c0_i32_1 = arith.constant 0 : i32
    return %c0_i32, %c0_i32_0 : i32, i32
  }
  func.func @transform_6(%arg0: i32) -> (i32, i32) {
    %c0_i32 = arith.constant 0 : i32
    %c0_i32_0 = arith.constant 0 : i32
    %c0_i32_1 = arith.constant 0 : i32
    return %c0_i32, %c0_i32_0 : i32, i32
  }
  func.func @transform_7(%arg0: i32) -> (i32, i32) {
    %c0_i32 = arith.constant 0 : i32
    %c0_i32_0 = arith.constant 0 : i32
    return %arg0, %c0_i32 : i32, i32
  }
}

module attributes {stable_mosaic.version = 11 : i64} {
  func.func @_mlp_kernel(%arg0: i32, %arg1: memref<16x4xf32, #tpu.memory_space<vmem>>, %arg2: memref<4x128xf32, #tpu.memory_space<vmem>>, %arg3: memref<1x128xf32, #tpu.memory_space<vmem>>, %arg4: memref<128x128xf32, #tpu.memory_space<vmem>>, %arg5: memref<1x128xf32, #tpu.memory_space<vmem>>, %arg6: memref<128x2xf32, #tpu.memory_space<vmem>>, %arg7: memref<1x2xf32, #tpu.memory_space<vmem>>, %arg8: memref<16x2xf32, #tpu.memory_space<vmem>>) attributes {dimension_semantics = [#tpu.dimension_semantics<parallel>], iteration_bounds = array<i64: 4>, scalar_prefetch = 0 : i64, scratch_operands = 0 : i64, tpu.core_type = #tpu.core_type<tc>, window_params = [{transform_indices = @transform_0, window_bounds = array<i64: 16, 4>}, {pipeline_mode = #tpu.pipeline_mode<synchronous>, transform_indices = @transform_1, window_bounds = array<i64: 4, 128>}, {pipeline_mode = #tpu.pipeline_mode<synchronous>, transform_indices = @transform_2, window_bounds = array<i64: 1, 128>}, {pipeline_mode = #tpu.pipeline_mode<synchronous>, transform_indices = @transform_3, window_bounds = array<i64: 128, 128>}, {pipeline_mode = #tpu.pipeline_mode<synchronous>, transform_indices = @transform_4, window_bounds = array<i64: 1, 128>}, {pipeline_mode = #tpu.pipeline_mode<synchronous>, transform_indices = @transform_5, window_bounds = array<i64: 128, 2>}, {pipeline_mode = #tpu.pipeline_mode<synchronous>, transform_indices = @transform_6, window_bounds = array<i64: 1, 2>}, {transform_indices = @transform_7, window_bounds = array<i64: 16, 2>}]} {
    %c0 = arith.constant 0 : index
    %c0_0 = arith.constant 0 : index
    %0 = vector.load %arg1[%c0, %c0_0] : memref<16x4xf32, #tpu.memory_space<vmem>>, vector<16x4xf32>
    %c0_1 = arith.constant 0 : index
    %c0_2 = arith.constant 0 : index
    %1 = vector.load %arg2[%c0_1, %c0_2] : memref<4x128xf32, #tpu.memory_space<vmem>>, vector<4x128xf32>
    %cst = arith.constant dense<0.000000e+00> : vector<16x128xf32>
    %2 = tpu.matmul %0, %1, %cst {dimension_numbers = #tpu.dot_dimension_numbers<[1], [0], [0], [1], [0, 0, 1, 1], [], []>} : vector<16x4xf32>, vector<4x128xf32>, vector<16x128xf32> -> vector<16x128xf32>
    %c0_3 = arith.constant 0 : index
    %c0_4 = arith.constant 0 : index
    %3 = vector.load %arg3[%c0_3, %c0_4] : memref<1x128xf32, #tpu.memory_space<vmem>>, vector<1x128xf32>
    %4 = vector.broadcast %3 : vector<1x128xf32> to vector<16x128xf32>
    %5 = arith.addf %2, %4 : vector<16x128xf32>
    %cst_5 = arith.constant 0.000000e+00 : f32
    %6 = vector.broadcast %cst_5 : f32 to vector<16x128xf32>
    %7 = arith.maximumf %5, %6 : vector<16x128xf32>
    %c0_6 = arith.constant 0 : index
    %c0_7 = arith.constant 0 : index
    %8 = vector.load %arg4[%c0_6, %c0_7] : memref<128x128xf32, #tpu.memory_space<vmem>>, vector<128x128xf32>
    %cst_8 = arith.constant dense<0.000000e+00> : vector<16x128xf32>
    %9 = tpu.matmul %7, %8, %cst_8 {dimension_numbers = #tpu.dot_dimension_numbers<[1], [0], [0], [1], [0, 0, 1, 1], [], []>} : vector<16x128xf32>, vector<128x128xf32>, vector<16x128xf32> -> vector<16x128xf32>
    %c0_9 = arith.constant 0 : index
    %c0_10 = arith.constant 0 : index
    %10 = vector.load %arg5[%c0_9, %c0_10] : memref<1x128xf32, #tpu.memory_space<vmem>>, vector<1x128xf32>
    %11 = vector.broadcast %10 : vector<1x128xf32> to vector<16x128xf32>
    %12 = arith.addf %9, %11 : vector<16x128xf32>
    %cst_11 = arith.constant 0.000000e+00 : f32
    %13 = vector.broadcast %cst_11 : f32 to vector<16x128xf32>
    %14 = arith.maximumf %12, %13 : vector<16x128xf32>
    %c0_12 = arith.constant 0 : index
    %c0_13 = arith.constant 0 : index
    %15 = vector.load %arg6[%c0_12, %c0_13] : memref<128x2xf32, #tpu.memory_space<vmem>>, vector<128x2xf32>
    %cst_14 = arith.constant dense<0.000000e+00> : vector<16x2xf32>
    %16 = tpu.matmul %14, %15, %cst_14 {dimension_numbers = #tpu.dot_dimension_numbers<[1], [0], [0], [1], [0, 0, 1, 1], [], []>} : vector<16x128xf32>, vector<128x2xf32>, vector<16x2xf32> -> vector<16x2xf32>
    %c0_15 = arith.constant 0 : index
    %c0_16 = arith.constant 0 : index
    %17 = vector.load %arg7[%c0_15, %c0_16] : memref<1x2xf32, #tpu.memory_space<vmem>>, vector<1x2xf32>
    %18 = vector.broadcast %17 : vector<1x2xf32> to vector<16x2xf32>
    %19 = arith.addf %16, %18 : vector<16x2xf32>
    %c0_17 = arith.constant 0 : index
    %c0_18 = arith.constant 0 : index
    %20 = vector.load %arg8[%c0_17, %c0_18] : memref<16x2xf32, #tpu.memory_space<vmem>>, vector<16x2xf32>
    tpu.vector_store %arg8[%c0_17, %c0_18], %19 {strides = array<i32>} : memref<16x2xf32, #tpu.memory_space<vmem>>, vector<16x2xf32>,
    return
  }
  func.func @transform_0(%arg0: i32) -> (i32, i32) {
    %c0_i32 = arith.constant 0 : i32
    %c0_i32_0 = arith.constant 0 : i32
    return %arg0, %c0_i32 : i32, i32
  }
  func.func @transform_1(%arg0: i32) -> (i32, i32) {
    %c0_i32 = arith.constant 0 : i32
    %c0_i32_0 = arith.constant 0 : i32
    %c0_i32_1 = arith.constant 0 : i32
    return %c0_i32, %c0_i32_0 : i32, i32
  }
  func.func @transform_2(%arg0: i32) -> (i32, i32) {
    %c0_i32 = arith.constant 0 : i32
    %c0_i32_0 = arith.constant 0 : i32
    %c0_i32_1 = arith.constant 0 : i32
    return %c0_i32, %c0_i32_0 : i32, i32
  }
  func.func @transform_3(%arg0: i32) -> (i32, i32) {
    %c0_i32 = arith.constant 0 : i32
    %c0_i32_0 = arith.constant 0 : i32
    %c0_i32_1 = arith.constant 0 : i32
    return %c0_i32, %c0_i32_0 : i32, i32
  }
  func.func @transform_4(%arg0: i32) -> (i32, i32) {
    %c0_i32 = arith.constant 0 : i32
    %c0_i32_0 = arith.constant 0 : i32
    %c0_i32_1 = arith.constant 0 : i32
    return %c0_i32, %c0_i32_0 : i32, i32
  }
  func.func @transform_5(%arg0: i32) -> (i32, i32) {
    %c0_i32 = arith.constant 0 : i32
    %c0_i32_0 = arith.constant 0 : i32
    %c0_i32_1 = arith.constant 0 : i32
    return %c0_i32, %c0_i32_0 : i32, i32
  }
  func.func @transform_6(%arg0: i32) -> (i32, i32) {
    %c0_i32 = arith.constant 0 : i32
    %c0_i32_0 = arith.constant 0 : i32
    %c0_i32_1 = arith.constant 0 : i32
    return %c0_i32, %c0_i32_0 : i32, i32
  }
  func.func @transform_7(%arg0: i32) -> (i32, i32) {
    %c0_i32 = arith.constant 0 : i32
    %c0_i32_0 = arith.constant 0 : i32
    return %arg0, %c0_i32 : i32, i32
  }
}

</mosaic_0001>

<bundles_post_ra>
// kernel: _mlp_pallas.1
= control target key start
LH: loop header
LB: loop body
LE: loop exit
PB: predicated region body
PF: predicated region fallthrough
CT: control target
= control target key end

     0   :  { %s577_s24 = smov 0   ;;  %s711_s0 = inlined_call_operand.vmem [shape: f32[64,4], index: 0, kind: input, shape index: {}]   ;;  %s712_s1 = inlined_call_operand.vmem [shape: f32[4,128], index: 1, kind: input, shape index: {}]   ;;  %s713_s2 = inlined_call_operand.vmem [shape: f32[1,128], index: 2, kind: input, shape index: {}]   ;;  %s714_s3 = inlined_call_operand.vmem [shape: f32[128,128], index: 3, kind: input, shape index: {}]   ;;  %s715_s4 = inlined_call_operand.vmem [shape: f32[1,128], index: 4, kind: input, shape index: {}]   ;;  %s716_s5 = inlined_call_operand.vmem [shape: f32[128,2], index: 5, kind: input, shape index: {}]   ;;  %s717_s6 = inlined_call_operand.vmem [shape: f32[1,2], index: 6, kind: input, shape index: {}]   ;;  %s718_s7 = inlined_call_operand.vmem [shape: f32[64,2], index: 7, kind: output, shape index: {}]  }
   0x1 LB: > { %s472_s25 = sadd.s32 4294967295, %s535_s24   ;;  %p476_p0 = scmp.ge.s32.totalorder %s535_s24, 1  ;;  %s535_s24 = sphi %s577_s24, %s17_s24  }
   0x2   : > { %p238_p1 = scmp.lt.s32.totalorder %s535_s24, 5 }
   0x4   : > { %p239_p2 = pnand %p476_p0, %p238_p1 }
   0x5   : > { %s477_s28 = sshll.u32 (!%p239_p2), %s472_s25, 1 }
   0x6   : > { %242 = sbr.rel (%p239_p2) target bundleno = 424 (0x1a8), region = 48  ;;  %p271_p3 = scmp.lt.s32.totalorder (!%p239_p2), %s477_s28, 7 }
   0xb   : > { %v284_v0 = vld [vmem:[%s712_s1] sm:$0xf]  ;;  %vm296_vm0 = vcmask 1043456   ;;  %v340_v1 = vld [vmem:[%s714_s3 + $0x78] sm:$0xff]  ;;  %v339_v2 = vld [vmem:[%s714_s3 + $0x70] sm:$0xff]  ;;  %s720_s28 = smov (!%p271_p3, %s477_s28), 7 }
   0xc   : > { %481 = vmatpush.msk.msra.mxu0 %vm296_vm0, %v284_v0  ;;  %345 = vmatpush.msra.mxu1 %v340_v1  ;;  %v338_v3 = vld [vmem:[%s714_s3 + $0x68] sm:$0xff]  ;;  %v337_v4 = vld [vmem:[%s714_s3 + $0x60] sm:$0xff]  ;;  %s478_s14 = sshll.u32 %s720_s28, 3  ;;  %vm289_vm1 = vcmask 31744   ;;  %v336_v5 = vld [vmem:[%s714_s3 + $0x58] sm:$0xff]  ;;  %vm413_vm2 = vcmask 15360  }
   0xd   : > { %486 = vmatpush.msra.mxu3 %v340_v1  ;;  %s274_s17 = scalar_lea.vmem %s711_s0, %s478_s14  ;;  %v335_v7 = vld [vmem:[%s714_s3 + $0x50] sm:$0xff]  ;;  %v334_v8 = vld [vmem:[%s714_s3 + $0x48] sm:$0xff]  ;;  %v333_v9 = vld [vmem:[%s714_s3 + $0x40] sm:$0xff]  ;;  %s280_s22 = scalar_lea.vmem %s718_s7, %s478_s14 }
   0xe   : > { %346 = vmatpush.msra.mxu1 %v339_v2  ;;  %v282_v6 = vld [vmem:[%s274_s17] sm:$0xff]  ;;  %v283_v10 = vld [vmem:[%s274_s17 + $0x8] sm:$0xff]  ;;  %v332_v11 = vld [vmem:[%s714_s3 + $0x38] sm:$0xff] }
   0xf   : > { %487 = vmatpush.msra.mxu3 %v339_v2  ;;  %482 = vmatmul.msk.f32.vlgmr.msra.gmra.mxu0 %vm289_vm1, %v282_v6  ;;  %v331_v12 = vld [vmem:[%s714_s3 + $0x30] sm:$0xff]  ;;  %v330_v13 = vld [vmem:[%s714_s3 + $0x28] sm:$0xff]  ;;  %v329_v14 = vld [vmem:[%s714_s3 + $0x20] sm:$0xff] }
  0x10   : > { %347 = vmatpush.msra.mxu1 %v338_v3  ;;  %v328_v15 = vld [vmem:[%s714_s3 + $0x18] sm:$0xff]  ;;  %v327_v16 = vld [vmem:[%s714_s3 + $0x10] sm:$0xff]  ;;  %v326_v17 = vld [vmem:[%s714_s3 + $0x8] sm:$0xff] }
  0x11   : > { %488 = vmatpush.msra.mxu3 %v338_v3  ;;  %v325_v18 = vld [vmem:[%s714_s3] sm:$0xff]  ;;  %v385_v19 = vld [vmem:[%s716_s5 + $0x78] sm:$0xff]  ;;  %v384_v20 = vld [vmem:[%s716_s5 + $0x70] sm:$0xff] }
  0x12   : > { %348 = vmatpush.msra.mxu1 %v337_v4  ;;  %390 = vmatpush.msrb.mxu0 %v385_v19  ;;  %v383_v21 = vld [vmem:[%s716_s5 + $0x68] sm:$0xff]  ;;  %v382_v22 = vld [vmem:[%s716_s5 + $0x60] sm:$0xff]  ;;  %v381_v23 = vld [vmem:[%s716_s5 + $0x58] sm:$0xff] }
  0x13   : > { %489 = vmatpush.msra.mxu3 %v337_v4  ;;  %502 = vmatpush.msra.mxu2 %v385_v19  ;;  %v380_v24 = vld [vmem:[%s716_s5 + $0x50] sm:$0xff]  ;;  %v379_v25 = vld [vmem:[%s716_s5 + $0x48] sm:$0xff]  ;;  %v378_v26 = vld [vmem:[%s716_s5 + $0x40] sm:$0xff] }
  0x14   : > { %349 = vmatpush.msra.mxu1 %v336_v5  ;;  %391 = vmatpush.msrb.mxu0 %v384_v20  ;;  %v377_v27 = vld [vmem:[%s716_s5 + $0x38] sm:$0xff]  ;;  %v526_v28 = vld [vmem:[%s713_s2] ss:$0 sm:$0xff]  ;;  %v376_v29 = vld [vmem:[%s716_s5 + $0x30] sm:$0xff] }
  0x15   : > { %490 = vmatpush.msra.mxu3 %v336_v5  ;;  %503 = vmatpush.msra.mxu2 %v384_v20  ;;  %v375_v30 = vld [vmem:[%s716_s5 + $0x28] sm:$0xff]  ;;  %v374_v33 = vld [vmem:[%s716_s5 + $0x20] sm:$0xff]  ;;  %v373_v35 = vld [vmem:[%s716_s5 + $0x18] sm:$0xff] }
  0x16   : > { %350 = vmatpush.msra.mxu1 %v335_v7  ;;  %392 = vmatpush.msrb.mxu0 %v383_v21  ;;  %v372_v39 = vld [vmem:[%s716_s5 + $0x10] sm:$0xff]  ;;  %v371_v40 = vld [vmem:[%s716_s5 + $0x8] sm:$0xff]  ;;  %v370_v41 = vld [vmem:[%s716_s5] sm:$0xff] }
  0x17   : > { %491 = vmatpush.msra.mxu3 %v335_v7  ;;  %483 = vmatmul.msk.f32.gmra.mxu0 %vm289_vm1, %v283_v10  ;;  %v527_v42 = vld [vmem:[%s715_s4] ss:$0 sm:$0xff] }
  0x18   : > { %351 = vmatpush.msra.mxu1 %v334_v8  ;;  %504 = vmatpush.msra.mxu2 %v383_v21  ;;  %v528_v49 = vld [vmem:[%s717_s6] ss:$0 sm:$0xff] }
  0x19   : > { %492 = vmatpush.msra.mxu3 %v334_v8  ;;  %393 = vmatpush.msrb.mxu0 %v382_v22 }
  0x1a   : > { %352 = vmatpush.msra.mxu1 %v333_v9  ;;  %505 = vmatpush.msra.mxu2 %v382_v22 }
  0x1b   : > { %493 = vmatpush.msra.mxu3 %v333_v9  ;;  %394 = vmatpush.msrb.mxu0 %v381_v23 }
  0x1c   : > { %353 = vmatpush.msra.mxu1 %v332_v11  ;;  %506 = vmatpush.msra.mxu2 %v381_v23 }
  0x1d   : > { %494 = vmatpush.msra.mxu3 %v332_v11  ;;  %395 = vmatpush.msrb.mxu0 %v380_v24 }
  0x1e   : > { %354 = vmatpush.msra.mxu1 %v331_v12  ;;  %507 = vmatpush.msra.mxu2 %v380_v24 }
  0x1f   : > { %495 = vmatpush.msra.mxu3 %v331_v12  ;;  %396 = vmatpush.msrb.mxu0 %v379_v25 }
  0x20   : > { %355 = vmatpush.msra.mxu1 %v330_v13  ;;  %508 = vmatpush.msra.mxu2 %v379_v25 }
  0x21   : > { %496 = vmatpush.msra.mxu3 %v330_v13  ;;  %397 = vmatpush.msrb.mxu0 %v378_v26 }
  0x22   : > { %356 = vmatpush.msra.mxu1 %v329_v14  ;;  %509 = vmatpush.msra.mxu2 %v378_v26 }
  0x23   : > { %497 = vmatpush.msra.mxu3 %v329_v14  ;;  %398 = vmatpush.msrb.mxu0 %v377_v27 }
  0x24   : > { %357 = vmatpush.msra.mxu1 %v328_v15  ;;  %510 = vmatpush.msra.mxu2 %v377_v27 }
  0x25   : > { %498 = vmatpush.msra.mxu3 %v328_v15  ;;  %399 = vmatpush.msrb.mxu0 %v376_v29 }
  0x26   : > { %358 = vmatpush.msra.mxu1 %v327_v16  ;;  %511 = vmatpush.msra.mxu2 %v376_v29 }
  0x27   : > { %499 = vmatpush.msra.mxu3 %v327_v16  ;;  %400 = vmatpush.msrb.mxu0 %v375_v30 }
  0x28   : > { %359 = vmatpush.msra.mxu1 %v326_v17  ;;  %512 = vmatpush.msra.mxu2 %v375_v30 }
  0x29   : > { %500 = vmatpush.msra.mxu3 %v326_v17  ;;  %401 = vmatpush.msrb.mxu0 %v374_v33 }
  0x2a   : > { %360 = vmatpush.msra.mxu1 %v325_v18  ;;  %513 = vmatpush.msra.mxu2 %v374_v33 }
  0x2b   : > { %501 = vmatpush.msra.mxu3 %v325_v18  ;;  %402 = vmatpush.msrb.mxu0 %v373_v35 }
  0x2c   : > { %514 = vmatpush.msra.mxu2 %v373_v35 }
  0x2d   : > { %403 = vmatpush.msrb.mxu0 %v372_v39 }
  0x2e   : > { %515 = vmatpush.msra.mxu2 %v372_v39 }
  0x2f   : > { %404 = vmatpush.msrb.mxu0 %v371_v40 }
  0x30   : > { %516 = vmatpush.msra.mxu2 %v371_v40 }
  0x31   : > { %405 = vmatpush.msrb.mxu0 %v370_v41 }
  0x32   : > { %517 = vmatpush.msra.mxu2 %v370_v41 }
  0x8c   : > { %v317_v31 = vpop.f32.mrf.mxu0 }
  0x8d   : > { %v318_v32 = vadd.f32 %v526_v28, %v317_v31 }
  0x8f   : > { %v323_v34 = vmax.f32 %v318_v32, 0.0 }
  0x91   : > { %361 = vmatmul.f32.vlgmr.msra.gmra.mxu1 %v323_v34 }
  0x94   : > { %v320_v36 = vpop.f32.mrf.mxu0 }
  0x95   : > { %v321_v37 = vadd.f32 %v526_v28, %v320_v36 }
  0x97   : > { %v324_v38 = vmax.f32 %v321_v37, 0.0 }
  0x99   : > { %364 = vmatmul.f32.vlgmr.msra.gmra.mxu3 %v324_v38 }
 0x10e   : > { %v362_v43 = vpop.f32.mrf.mxu1 }
 0x10f   : > { %v363_v44 = vadd.f32 %v527_v42, %v362_v43 }
 0x111   : > { %v368_v45 = vmax.f32 %v363_v44, 0.0 }
 0x113   : > { %406 = vmatmul.f32.vlgmr.msrb.gmra.mxu0 %v368_v45 }
 0x11c   : > { %v365_v46 = vpop.f32.mrf.mxu3 }
 0x11d   : > { %v366_v47 = vadd.f32 %v527_v42, %v365_v46 }
 0x11f   : > { %v369_v48 = vmax.f32 %v366_v47, 0.0 }
 0x121   : > { %409 = vmatmul.f32.vlgmr.msra.gmra.mxu2 %v369_v48 }
 0x190   : > { %v407_v50 = vpop.f32.mrf.mxu0 }
 0x191   : > { %v408_v51 = vadd.f32 %v528_v49, %v407_v50 }
 0x193   : > { %414 = vst.msk [vmem:[%s280_s22] sm:$0xff] %vm413_vm2, %v408_v51 }
 0x1a4   : > { %v410_v52 = vpop.f32.mrf.mxu2 }
 0x1a5   : > { %v411_v53 = vadd.f32 %v528_v49, %v410_v52 }
 0x1a7   : > { %415 = vst.msk [vmem:[%s280_s22 + $0x8] sm:$0xff] %vm413_vm2, %v411_v53 }
 0x1a8 PF: > { %s17_s24 = sadd.s32 1, %s535_s24  }
 0x1a9   : > { %p14_p4 = scmp.ge.s32.totalorder %s17_s24, 6  }
 0x1ab   :  { %16 = sbr.rel (!%p14_p4) target bundleno = 1 (0x1), region = 78 }

// kernel: _mlp_pallas.1
= control target key start
LH: loop header
LB: loop body
LE: loop exit
PB: predicated region body
PF: predicated region fallthrough
CT: control target
= control target key end

     0   :  { %s577_s24 = smov 0   ;;  %s711_s0 = inlined_call_operand.vmem [shape: f32[64,4], index: 0, kind: input, shape index: {}]   ;;  %s712_s1 = inlined_call_operand.vmem [shape: f32[4,128], index: 1, kind: input, shape index: {}]   ;;  %s713_s2 = inlined_call_operand.vmem [shape: f32[1,128], index: 2, kind: input, shape index: {}]   ;;  %s714_s3 = inlined_call_operand.vmem [shape: f32[128,128], index: 3, kind: input, shape index: {}]   ;;  %s715_s4 = inlined_call_operand.vmem [shape: f32[1,128], index: 4, kind: input, shape index: {}]   ;;  %s716_s5 = inlined_call_operand.vmem [shape: f32[128,2], index: 5, kind: input, shape index: {}]   ;;  %s717_s6 = inlined_call_operand.vmem [shape: f32[1,2], index: 6, kind: input, shape index: {}]   ;;  %s718_s7 = inlined_call_operand.vmem [shape: f32[64,2], index: 7, kind: output, shape index: {}]  }
   0x1 LB: > { %s472_s25 = sadd.s32 4294967295, %s535_s24   ;;  %p476_p0 = scmp.ge.s32.totalorder %s535_s24, 1  ;;  %s535_s24 = sphi %s577_s24, %s17_s24  }
   0x2   : > { %p238_p1 = scmp.lt.s32.totalorder %s535_s24, 5 }
   0x4   : > { %p239_p2 = pnand %p476_p0, %p238_p1 }
   0x5   : > { %s477_s28 = sshll.u32 (!%p239_p2), %s472_s25, 1 }
   0x6   : > { %242 = sbr.rel (%p239_p2) target bundleno = 424 (0x1a8), region = 48  ;;  %p271_p3 = scmp.lt.s32.totalorder (!%p239_p2), %s477_s28, 7 }
   0xb   : > { %v284_v0 = vld [vmem:[%s712_s1] sm:$0xf]  ;;  %vm296_vm0 = vcmask 1043456   ;;  %v340_v1 = vld [vmem:[%s714_s3 + $0x78] sm:$0xff]  ;;  %v339_v2 = vld [vmem:[%s714_s3 + $0x70] sm:$0xff]  ;;  %s720_s28 = smov (!%p271_p3, %s477_s28), 7 }
   0xc   : > { %481 = vmatpush.msk.msra.mxu0 %vm296_vm0, %v284_v0  ;;  %345 = vmatpush.msra.mxu1 %v340_v1  ;;  %v338_v3 = vld [vmem:[%s714_s3 + $0x68] sm:$0xff]  ;;  %v337_v4 = vld [vmem:[%s714_s3 + $0x60] sm:$0xff]  ;;  %s478_s14 = sshll.u32 %s720_s28, 3  ;;  %vm289_vm1 = vcmask 31744   ;;  %v336_v5 = vld [vmem:[%s714_s3 + $0x58] sm:$0xff]  ;;  %vm413_vm2 = vcmask 15360  }
   0xd   : > { %486 = vmatpush.msra.mxu3 %v340_v1  ;;  %s274_s17 = scalar_lea.vmem %s711_s0, %s478_s14  ;;  %v335_v7 = vld [vmem:[%s714_s3 + $0x50] sm:$0xff]  ;;  %v334_v8 = vld [vmem:[%s714_s3 + $0x48] sm:$0xff]  ;;  %v333_v9 = vld [vmem:[%s714_s3 + $0x40] sm:$0xff]  ;;  %s280_s22 = scalar_lea.vmem %s718_s7, %s478_s14 }
   0xe   : > { %346 = vmatpush.msra.mxu1 %v339_v2  ;;  %v282_v6 = vld [vmem:[%s274_s17] sm:$0xff]  ;;  %v283_v10 = vld [vmem:[%s274_s17 + $0x8] sm:$0xff]  ;;  %v332_v11 = vld [vmem:[%s714_s3 + $0x38] sm:$0xff] }
   0xf   : > { %487 = vmatpush.msra.mxu3 %v339_v2  ;;  %482 = vmatmul.msk.f32.vlgmr.msra.gmra.mxu0 %vm289_vm1, %v282_v6  ;;  %v331_v12 = vld [vmem:[%s714_s3 + $0x30] sm:$0xff]  ;;  %v330_v13 = vld [vmem:[%s714_s3 + $0x28] sm:$0xff]  ;;  %v329_v14 = vld [vmem:[%s714_s3 + $0x20] sm:$0xff] }
  0x10   : > { %347 = vmatpush.msra.mxu1 %v338_v3  ;;  %v328_v15 = vld [vmem:[%s714_s3 + $0x18] sm:$0xff]  ;;  %v327_v16 = vld [vmem:[%s714_s3 + $0x10] sm:$0xff]  ;;  %v326_v17 = vld [vmem:[%s714_s3 + $0x8] sm:$0xff] }
  0x11   : > { %488 = vmatpush.msra.mxu3 %v338_v3  ;;  %v325_v18 = vld [vmem:[%s714_s3] sm:$0xff]  ;;  %v385_v19 = vld [vmem:[%s716_s5 + $0x78] sm:$0xff]  ;;  %v384_v20 = vld [vmem:[%s716_s5 + $0x70] sm:$0xff] }
  0x12   : > { %348 = vmatpush.msra.mxu1 %v337_v4  ;;  %390 = vmatpush.msrb.mxu0 %v385_v19  ;;  %v383_v21 = vld [vmem:[%s716_s5 + $0x68] sm:$0xff]  ;;  %v382_v22 = vld [vmem:[%s716_s5 + $0x60] sm:$0xff]  ;;  %v381_v23 = vld [vmem:[%s716_s5 + $0x58] sm:$0xff] }
  0x13   : > { %489 = vmatpush.msra.mxu3 %v337_v4  ;;  %502 = vmatpush.msra.mxu2 %v385_v19  ;;  %v380_v24 = vld [vmem:[%s716_s5 + $0x50] sm:$0xff]  ;;  %v379_v25 = vld [vmem:[%s716_s5 + $0x48] sm:$0xff]  ;;  %v378_v26 = vld [vmem:[%s716_s5 + $0x40] sm:$0xff] }
  0x14   : > { %349 = vmatpush.msra.mxu1 %v336_v5  ;;  %391 = vmatpush.msrb.mxu0 %v384_v20  ;;  %v377_v27 = vld [vmem:[%s716_s5 + $0x38] sm:$0xff]  ;;  %v526_v28 = vld [vmem:[%s713_s2] ss:$0 sm:$0xff]  ;;  %v376_v29 = vld [vmem:[%s716_s5 + $0x30] sm:$0xff] }
  0x15   : > { %490 = vmatpush.msra.mxu3 %v336_v5  ;;  %503 = vmatpush.msra.mxu2 %v384_v20  ;;  %v375_v30 = vld [vmem:[%s716_s5 + $0x28] sm:$0xff]  ;;  %v374_v33 = vld [vmem:[%s716_s5 + $0x20] sm:$0xff]  ;;  %v373_v35 = vld [vmem:[%s716_s5 + $0x18] sm:$0xff] }
  0x16   : > { %350 = vmatpush.msra.mxu1 %v335_v7  ;;  %392 = vmatpush.msrb.mxu0 %v383_v21  ;;  %v372_v39 = vld [vmem:[%s716_s5 + $0x10] sm:$0xff]  ;;  %v371_v40 = vld [vmem:[%s716_s5 + $0x8] sm:$0xff]  ;;  %v370_v41 = vld [vmem:[%s716_s5] sm:$0xff] }
  0x17   : > { %491 = vmatpush.msra.mxu3 %v335_v7  ;;  %483 = vmatmul.msk.f32.gmra.mxu0 %vm289_vm1, %v283_v10  ;;  %v527_v42 = vld [vmem:[%s715_s4] ss:$0 sm:$0xff] }
  0x18   : > { %351 = vmatpush.msra.mxu1 %v334_v8  ;;  %504 = vmatpush.msra.mxu2 %v383_v21  ;;  %v528_v49 = vld [vmem:[%s717_s6] ss:$0 sm:$0xff] }
  0x19   : > { %492 = vmatpush.msra.mxu3 %v334_v8  ;;  %393 = vmatpush.msrb.mxu0 %v382_v22 }
  0x1a   : > { %352 = vmatpush.msra.mxu1 %v333_v9  ;;  %505 = vmatpush.msra.mxu2 %v382_v22 }
  0x1b   : > { %493 = vmatpush.msra.mxu3 %v333_v9  ;;  %394 = vmatpush.msrb.mxu0 %v381_v23 }
  0x1c   : > { %353 = vmatpush.msra.mxu1 %v332_v11  ;;  %506 = vmatpush.msra.mxu2 %v381_v23 }
  0x1d   : > { %494 = vmatpush.msra.mxu3 %v332_v11  ;;  %395 = vmatpush.msrb.mxu0 %v380_v24 }
  0x1e   : > { %354 = vmatpush.msra.mxu1 %v331_v12  ;;  %507 = vmatpush.msra.mxu2 %v380_v24 }
  0x1f   : > { %495 = vmatpush.msra.mxu3 %v331_v12  ;;  %396 = vmatpush.msrb.mxu0 %v379_v25 }
  0x20   : > { %355 = vmatpush.msra.mxu1 %v330_v13  ;;  %508 = vmatpush.msra.mxu2 %v379_v25 }
  0x21   : > { %496 = vmatpush.msra.mxu3 %v330_v13  ;;  %397 = vmatpush.msrb.mxu0 %v378_v26 }
  0x22   : > { %356 = vmatpush.msra.mxu1 %v329_v14  ;;  %509 = vmatpush.msra.mxu2 %v378_v26 }
  0x23   : > { %497 = vmatpush.msra.mxu3 %v329_v14  ;;  %398 = vmatpush.msrb.mxu0 %v377_v27 }
  0x24   : > { %357 = vmatpush.msra.mxu1 %v328_v15  ;;  %510 = vmatpush.msra.mxu2 %v377_v27 }
  0x25   : > { %498 = vmatpush.msra.mxu3 %v328_v15  ;;  %399 = vmatpush.msrb.mxu0 %v376_v29 }
  0x26   : > { %358 = vmatpush.msra.mxu1 %v327_v16  ;;  %511 = vmatpush.msra.mxu2 %v376_v29 }
  0x27   : > { %499 = vmatpush.msra.mxu3 %v327_v16  ;;  %400 = vmatpush.msrb.mxu0 %v375_v30 }
  0x28   : > { %359 = vmatpush.msra.mxu1 %v326_v17  ;;  %512 = vmatpush.msra.mxu2 %v375_v30 }
  0x29   : > { %500 = vmatpush.msra.mxu3 %v326_v17  ;;  %401 = vmatpush.msrb.mxu0 %v374_v33 }
  0x2a   : > { %360 = vmatpush.msra.mxu1 %v325_v18  ;;  %513 = vmatpush.msra.mxu2 %v374_v33 }
  0x2b   : > { %501 = vmatpush.msra.mxu3 %v325_v18  ;;  %402 = vmatpush.msrb.mxu0 %v373_v35 }
  0x2c   : > { %514 = vmatpush.msra.mxu2 %v373_v35 }
  0x2d   : > { %403 = vmatpush.msrb.mxu0 %v372_v39 }
  0x2e   : > { %515 = vmatpush.msra.mxu2 %v372_v39 }
  0x2f   : > { %404 = vmatpush.msrb.mxu0 %v371_v40 }
  0x30   : > { %516 = vmatpush.msra.mxu2 %v371_v40 }
  0x31   : > { %405 = vmatpush.msrb.mxu0 %v370_v41 }
  0x32   : > { %517 = vmatpush.msra.mxu2 %v370_v41 }
  0x8c   : > { %v317_v31 = vpop.f32.mrf.mxu0 }
  0x8d   : > { %v318_v32 = vadd.f32 %v526_v28, %v317_v31 }
  0x8f   : > { %v323_v34 = vmax.f32 %v318_v32, 0.0 }
  0x91   : > { %361 = vmatmul.f32.vlgmr.msra.gmra.mxu1 %v323_v34 }
  0x94   : > { %v320_v36 = vpop.f32.mrf.mxu0 }
  0x95   : > { %v321_v37 = vadd.f32 %v526_v28, %v320_v36 }
  0x97   : > { %v324_v38 = vmax.f32 %v321_v37, 0.0 }
  0x99   : > { %364 = vmatmul.f32.vlgmr.msra.gmra.mxu3 %v324_v38 }
 0x10e   : > { %v362_v43 = vpop.f32.mrf.mxu1 }
 0x10f   : > { %v363_v44 = vadd.f32 %v527_v42, %v362_v43 }
 0x111   : > { %v368_v45 = vmax.f32 %v363_v44, 0.0 }
 0x113   : > { %406 = vmatmul.f32.vlgmr.msrb.gmra.mxu0 %v368_v45 }
 0x11c   : > { %v365_v46 = vpop.f32.mrf.mxu3 }
 0x11d   : > { %v366_v47 = vadd.f32 %v527_v42, %v365_v46 }
 0x11f   : > { %v369_v48 = vmax.f32 %v366_v47, 0.0 }
 0x121   : > { %409 = vmatmul.f32.vlgmr.msra.gmra.mxu2 %v369_v48 }
 0x190   : > { %v407_v50 = vpop.f32.mrf.mxu0 }
 0x191   : > { %v408_v51 = vadd.f32 %v528_v49, %v407_v50 }
 0x193   : > { %414 = vst.msk [vmem:[%s280_s22] sm:$0xff] %vm413_vm2, %v408_v51 }
 0x1a4   : > { %v410_v52 = vpop.f32.mrf.mxu2 }
 0x1a5   : > { %v411_v53 = vadd.f32 %v528_v49, %v410_v52 }
 0x1a7   : > { %415 = vst.msk [vmem:[%s280_s22 + $0x8] sm:$0xff] %vm413_vm2, %v411_v53 }
 0x1a8 PF: > { %s17_s24 = sadd.s32 1, %s535_s24  }
 0x1a9   : > { %p14_p4 = scmp.ge.s32.totalorder %s17_s24, 6  }
 0x1ab   :  { %16 = sbr.rel (!%p14_p4) target bundleno = 1 (0x1), region = 78 }

</bundles_post_ra>
